<compile_context>
chip_gen: v5e
topology: v5e:2x2
jax: 0.10.0
libtpu: 0.0.40
codegen_flags: <defaults>
</compile_context>

<pallas_src>
import functools

import jax
import jax.numpy as jnp
from jax.experimental import pallas as pl
from jax.experimental.pallas import tpu as pltpu


def _round_up(x, m):
    return ((x + m - 1) // m) * m


_FALLBACK_PHYS_VMEM = 64 * 1024 * 1024  # v7x (smallest of v5e/v6e/v7x) — safe default


def _physical_vmem_bytes():
    """Best-effort physical VMEM query; conservative fallback if unavailable."""
    try:
        info = pltpu.get_tpu_info()
        v = getattr(info, "vmem_capacity_bytes", None)
        if v:
            return int(v)
    except Exception:
        pass
    return _FALLBACK_PHYS_VMEM


def _pick_lane_tile(dim, candidates):
    """Pick the candidate minimizing padded size; ties -> larger tile."""
    best_t, best_p = None, None
    for t in candidates:
        p = _round_up(dim, t)
        if best_p is None or p < best_p or (p == best_p and t > best_t):
            best_t, best_p = t, p
    return best_t


def _pick_tm(M, tn, tk, c_isize, o_isize, needs_acc, w_bufs, budget_bytes):
    """Pick tm (row tile) minimizing padding subject to the VMEM budget.

    Footprint model: 2x double-buffered X tile + w_bufs weight tiles +
    2x output tile + optional f32 accumulator + bias buffers.
    """
    sublane = {4: 8, 2: 16, 1: 32}.get(c_isize, 8)
    cap = 1024
    cands = set()
    for nb in (1, 2, 3, 4, 6, 8):
        t = _round_up(max(1, -(-M // nb)), sublane)
        cands.add(min(t, cap))
    cands.update((128, 256, 512, 1024))

    def footprint(tm):
        return (2 * tm * tk * c_isize            # X (double-buffered)
                + w_bufs * tk * tn * c_isize     # W^T buffers
                + 2 * tm * tn * o_isize          # output buffers
                + (tm * tn * 4 if needs_acc else 0)
                + 2 * tn * 4)                    # bias buffers

    feasible = [t for t in cands if footprint(t) <= budget_bytes]
    if not feasible:
        feasible = [sublane]
    best_t, best_p = None, None
    for t in feasible:
        p = _round_up(M, t)
        if best_p is None or p < best_p or (p == best_p and t > best_t):
            best_t, best_p = t, p
    return best_t


def _weight_block_spec(tk, tn, w_bufs):
    """W^T BlockSpec; request a 3-deep pipeline in the weight-streaming regime."""
    idx = lambda i, j, k: (k, j)
    if w_bufs > 2:
        try:
            return pl.BlockSpec((tk, tn), idx, pipeline_mode=pl.Buffered(w_bufs))
        except TypeError:
            pass  # pipeline_mode not supported in this jax version — fall back
    return pl.BlockSpec((tk, tn), idx)


def _make_mm_kernel(has_bias: bool, needs_acc: bool):
    """Build a Y = X @ Wt (+ b) kernel for grid (i, j, k); k is the reduction."""

    def kernel(*refs):
        if has_bias:
            x_ref, wt_ref, b_ref = refs[:3]
            rest = refs[3:]
        else:
            x_ref, wt_ref = refs[:2]
            b_ref = None
            rest = refs[2:]
        if needs_acc:
            o_ref, acc_ref = rest          # f32 VMEM scratch accumulator
        else:
            (o_ref,) = rest                # accumulate directly into f32 output
            acc_ref = o_ref

        k = pl.program_id(2)

        @pl.when(k == 0)
        def _():
            if b_ref is not None:
                # Fold bias into the accumulator init (off the store epilogue).
                acc_ref[...] = jnp.broadcast_to(
                    b_ref[...].astype(acc_ref.dtype), acc_ref.shape)
            else:
                acc_ref[...] = jnp.zeros_like(acc_ref)

        acc_ref[...] += jnp.dot(
            x_ref[...], wt_ref[...], preferred_element_type=jnp.float32)

        if needs_acc:
            @pl.when(k == pl.num_programs(2) - 1)
            def _():
                o_ref[...] = acc_ref[...].astype(o_ref.dtype)

    return kernel


@functools.partial(
    jax.jit,
    static_argnames=("N", "out_dtype", "tm", "tn", "tk", "w_bufs", "vmem_limit"))
def _matmul_bias(x2d, w_padded, bias, *, N, out_dtype, tm, tn, tk, w_bufs,
                 vmem_limit):
    """x2d: [M, K], w_padded: [Kp, Np] (pre-transposed + pre-padded weight),
    bias: [N] or None. Returns [M, N] in out_dtype."""
    out_dtype = jnp.dtype(out_dtype)
    M, K = x2d.shape
    Kp, Np = w_padded.shape
    Mp = _round_up(M, tm)

    # Zero K/M padding of X is exact for the matmul.
    if Mp != M or Kp != K:
        x2d = jnp.pad(x2d, ((0, Mp - M), (0, Kp - K)))

    has_bias = bias is not None
    needs_acc = out_dtype != jnp.dtype(jnp.float32)

    in_specs = [
        pl.BlockSpec((tm, tk), lambda i, j, k: (i, k)),   # X tile
        _weight_block_spec(tk, tn, w_bufs),               # W^T tile
    ]
    operands = [x2d, w_padded]
    if has_bias:
        b_p = bias.astype(jnp.float32).reshape(1, N)
        if Np != N:
            b_p = jnp.pad(b_p, ((0, 0), (0, Np - N)))
        in_specs.append(pl.BlockSpec((1, tn), lambda i, j, k: (0, j)))
        operands.append(b_p)

    scratch_shapes = [pltpu.VMEM((tm, tn), jnp.float32)] if needs_acc else []

    c_isize = jnp.dtype(x2d.dtype).itemsize
    o_isize = out_dtype.itemsize
    n_i, n_j, n_k = Mp // tm, Np // tn, Kp // tk
    cost = pl.CostEstimate(
        flops=2 * Mp * Np * Kp,
        transcendentals=0,
        # account for operand re-reads across the grid + bias
        bytes_accessed=(Mp * Kp * c_isize * n_j
                        + Kp * Np * c_isize * n_i
                        + Mp * Np * o_isize
                        + (Np * 4 * n_i if has_bias else 0)),
    )

    out = pl.pallas_call(
        _make_mm_kernel(has_bias, needs_acc),
        out_shape=jax.ShapeDtypeStruct((Mp, Np), out_dtype),
        grid_spec=pltpu.PrefetchScalarGridSpec(
            num_scalar_prefetch=0,
            grid=(n_i, n_j, n_k),
            in_specs=in_specs,
            out_specs=pl.BlockSpec((tm, tn), lambda i, j, k: (i, j)),
            scratch_shapes=scratch_shapes,
        ),
        compiler_params=pltpu.CompilerParams(
            dimension_semantics=("parallel", "parallel", "arbitrary"),
            vmem_limit_bytes=vmem_limit),
        cost_estimate=cost,
    )(*operands)

    if Mp != M or Np != N:
        out = out[:M, :N]
    return out


class RowParallelLinear:
    """JAX/Pallas re-implementation of Megatron's RowParallelLinear forward
    (single tensor-parallel rank: collectives are identities)."""

    def __init__(self, input_size, output_size, *, bias=True,
                 skip_bias_add=False, key=None, params_dtype=jnp.float32,
                 compute_dtype=None):
        self.input_size = input_size
        self.output_size = output_size
        self.skip_bias_add = skip_bias_add
        if key is None:
            key = jax.random.PRNGKey(0)
        # Deterministic init (mimics init_method ~ small-std normal).
        self.weight = (
            0.02 * jax.random.normal(key, (output_size, input_size))
        ).astype(params_dtype)
        # Explicit compute dtype (e.g. bf16 to hit v6e/v7x MXU peak and halve
        # X/W DMA bytes); defaults to params_dtype. Accumulation is always f32.
        self.compute_dtype = jnp.dtype(
            compute_dtype if compute_dtype is not None else params_dtype)

        # Lane tiles depend only on (K, N): pick once, 256-aligned preferred.
        self.tn = _pick_lane_tile(output_size, (512, 256, 128))
        self.tk = _pick_lane_tile(input_size, (1024, 512, 256, 128))
        Kp = _round_up(input_size, self.tk)
        Np = _round_up(output_size, self.tn)

        # Pre-transposed [K, N] AND pre-padded [Kp, Np] weight, computed ONCE
        # here — no per-call transpose or K*N pad traffic on the forward path.
        w_t = jnp.asarray(self.weight.T, dtype=self.compute_dtype)
        if Kp != input_size or Np != output_size:
            w_t = jnp.pad(w_t, ((0, Kp - input_size), (0, Np - output_size)))
        self.weight_t_padded = w_t

        # Bias is always initialized to zero in the reference module.
        self.bias = (jnp.zeros((output_size,), dtype=params_dtype)
                     if bias else None)

        # VMEM budgeting: explicit scoped limit, footprint kept below ~85% of
        # it (v7x: 64 MiB physical -> ~38 MiB limit; v5e/v6e: 128 -> ~76 MiB).
        phys = _physical_vmem_bytes()
        self._vmem_limit = min(max(32 << 20, int(phys * 0.6)), phys)
        self._vmem_budget = int(self._vmem_limit * 0.85)

    def __call__(self, input_):
        # input_: [sequence, batch, hidden]
        S, B, H = input_.shape
        assert H == self.input_size
        out_dtype = jnp.dtype(input_.dtype)
        x2d = input_.reshape(S * B, H)
        if x2d.dtype != self.compute_dtype:
            x2d = x2d.astype(self.compute_dtype)

        M, N = S * B, self.output_size
        Kp, _ = self.weight_t_padded.shape
        n_k = Kp // self.tk
        needs_acc = out_dtype != jnp.dtype(jnp.float32)
        c_isize = self.compute_dtype.itemsize
        o_isize = out_dtype.itemsize

        # Weight-streaming (small-M) regime: deepen the weight pipeline.
        w_bufs = 3 if (M <= 256 and n_k >= 3) else 2
        tm = _pick_tm(M, self.tn, self.tk, c_isize, o_isize, needs_acc,
                      w_bufs, self._vmem_budget)

        # skip_bias_add / no-bias -> compile the bias-free kernel variant
        # (no zero-bias array, no bias DMA, no init-branch broadcast).
        kernel_bias = (self.bias if (self.bias is not None and
                                     not self.skip_bias_add) else None)

        out2d = _matmul_bias(
            x2d, self.weight_t_padded, kernel_bias,
            N=N, out_dtype=out_dtype.name,
            tm=tm, tn=self.tn, tk=self.tk,
            w_bufs=w_bufs, vmem_limit=self._vmem_limit)

        output = out2d.reshape(S, B, N)
        output_bias = self.bias if self.skip_bias_add else None
        return output, output_bias


if __name__ == "__main__":
    # Small shapes consistent with the forward contract: [seq, batch, hidden].
    seq, batch, hidden, out_features = 8, 2, 256, 128

    key = jax.random.PRNGKey(0)
    k_x, k_w, k_b, k_x2, k_w2 = jax.random.split(key, 5)
    x = jax.random.normal(k_x, (seq, batch, hidden), dtype=jnp.float32)

    layer = RowParallelLinear(hidden, out_features, bias=True,
                              skip_bias_add=False, key=k_w)
    # Module semantics init bias to zero; perturb it here so the fused-bias
    # path is exercised numerically by the check below.
    layer.bias = 0.1 * jax.random.normal(k_b, (out_features,),
                                         dtype=jnp.float32)

    out, out_bias = layer(x)
    out = jax.block_until_ready(out)

    # Reference check against plain JAX (same math: X @ W^T + b).
    ref = jnp.einsum("sbh,oh->sbo", x, layer.weight) + layer.bias
    assert out.shape == (seq, batch, out_features)
    assert out_bias is None
    assert jnp.allclose(out, ref, atol=1e-4, rtol=1e-4)

    # skip_bias_add path: bias-free kernel variant, bias returned to caller.
    layer2 = RowParallelLinear(hidden, out_features, bias=True,
                               skip_bias_add=True, key=k_w)
    out2, out_bias2 = layer2(x)
    out2 = jax.block_until_ready(out2)
    ref2 = jnp.einsum("sbh,oh->sbo", x, layer2.weight)
    assert jnp.allclose(out2, ref2, atol=1e-4, rtol=1e-4)
    assert out_bias2 is not None and out_bias2.shape == (out_features,)

    # Ragged shapes: exercises M/K/N zero-padding and the 3-deep weight
    # pipeline (small M, >= 3 k-steps).
    seq3, batch3, hidden3, out3 = 5, 3, 320, 192
    x3 = jax.random.normal(k_x2, (seq3, batch3, hidden3), dtype=jnp.float32)
    layer3 = RowParallelLinear(hidden3, out3, bias=True,
                               skip_bias_add=False, key=k_w2)
    o3, _ = layer3(x3)
    o3 = jax.block_until_ready(o3)
    ref3 = jnp.einsum("sbh,oh->sbo", x3, layer3.weight)  # bias is zero
    assert jnp.allclose(o3, ref3, atol=1e-4, rtol=1e-4)

    print("KERNEL_OK")
</pallas_src>

<mosaic_0001>
module attributes {stable_mosaic.version = 11 : i64} {
  func.func @kernel(%arg0: i32, %arg1: i32, %arg2: i32, %arg3: memref<16x256xf32, #tpu.memory_space<vmem>>, %arg4: memref<256x128xf32, #tpu.memory_space<vmem>>, %arg5: memref<1x128xf32, #tpu.memory_space<vmem>>, %arg6: memref<16x128xf32, #tpu.memory_space<vmem>>) attributes {dimension_semantics = [#tpu.dimension_semantics<parallel>, #tpu.dimension_semantics<parallel>, #tpu.dimension_semantics<arbitrary>], iteration_bounds = array<i64: 1, 1, 1>, scalar_prefetch = 0 : i64, scratch_operands = 0 : i64, tpu.core_type = #tpu.core_type<tc>, window_params = [{transform_indices = @transform_0, window_bounds = array<i64: 16, 256>}, {transform_indices = @transform_1, window_bounds = array<i64: 256, 128>}, {transform_indices = @transform_2, window_bounds = array<i64: 1, 128>}, {transform_indices = @transform_3, window_bounds = array<i64: 16, 128>}]} {
    %c0_i32 = arith.constant 0 : i32
    %0 = arith.cmpi eq, %arg2, %c0_i32 : i32
    %1 = arith.extui %0 : i1 to i32
    %c0_i32_0 = arith.constant 0 : i32
    %2 = arith.cmpi ne, %1, %c0_i32_0 : i32
    scf.if %2 {
      %c0_8 = arith.constant 0 : index
      %c0_9 = arith.constant 0 : index
      %9 = vector.load %arg5[%c0_8, %c0_9] : memref<1x128xf32, #tpu.memory_space<vmem>>, vector<1x128xf32>
      %10 = vector.shape_cast %9 : vector<1x128xf32> to vector<1x128xf32>
      %11 = vector.broadcast %10 : vector<1x128xf32> to vector<16x128xf32>
      %c0_10 = arith.constant 0 : index
      %c0_11 = arith.constant 0 : index
      %12 = vector.load %arg6[%c0_10, %c0_11] : memref<16x128xf32, #tpu.memory_space<vmem>>, vector<16x128xf32>
      tpu.vector_store %arg6[%c0_10, %c0_11], %11 {strides = array<i32>} : memref<16x128xf32, #tpu.memory_space<vmem>>, vector<16x128xf32>,
    } else {
    }
    %c0 = arith.constant 0 : index
    %c0_1 = arith.constant 0 : index
    %3 = vector.load %arg6[%c0, %c0_1] : memref<16x128xf32, #tpu.memory_space<vmem>>, vector<16x128xf32>
    %c0_2 = arith.constant 0 : index
    %c0_3 = arith.constant 0 : index
    %4 = vector.load %arg3[%c0_2, %c0_3] : memref<16x256xf32, #tpu.memory_space<vmem>>, vector<16x256xf32>
    %c0_4 = arith.constant 0 : index
    %c0_5 = arith.constant 0 : index
    %5 = vector.load %arg4[%c0_4, %c0_5] : memref<256x128xf32, #tpu.memory_space<vmem>>, vector<256x128xf32>
    %cst = arith.constant dense<0.000000e+00> : vector<16x128xf32>
    %6 = tpu.matmul %4, %5, %cst {dimension_numbers = #tpu.dot_dimension_numbers<[1], [0], [0], [1], [0, 0, 1, 1], [], []>} : vector<16x256xf32>, vector<256x128xf32>, vector<16x128xf32> -> vector<16x128xf32>
    %7 = arith.addf %3, %6 : vector<16x128xf32>
    %c0_6 = arith.constant 0 : index
    %c0_7 = arith.constant 0 : index
    %8 = vector.load %arg6[%c0_6, %c0_7] : memref<16x128xf32, #tpu.memory_space<vmem>>, vector<16x128xf32>
    tpu.vector_store %arg6[%c0_6, %c0_7], %7 {strides = array<i32>} : memref<16x128xf32, #tpu.memory_space<vmem>>, vector<16x128xf32>,
    return
  }
  func.func @transform_0(%arg0: i32, %arg1: i32, %arg2: i32) -> (i32, i32) {
    %c0_i32 = arith.constant 0 : i32
    return %arg0, %arg2 : i32, i32
  }
  func.func @transform_1(%arg0: i32, %arg1: i32, %arg2: i32) -> (i32, i32) {
    %c0_i32 = arith.constant 0 : i32
    return %arg2, %arg1 : i32, i32
  }
  func.func @transform_2(%arg0: i32, %arg1: i32, %arg2: i32) -> (i32, i32) {
    %c0_i32 = arith.constant 0 : i32
    %c0_i32_0 = arith.constant 0 : i32
    return %c0_i32, %arg1 : i32, i32
  }
  func.func @transform_3(%arg0: i32, %arg1: i32, %arg2: i32) -> (i32, i32) {
    %c0_i32 = arith.constant 0 : i32
    return %arg0, %arg1 : i32, i32
  }
}

</mosaic_0001>

<bundles_post_ra>
// kernel: _matmul_bias.1
= control target key start
LH: loop header
LB: loop body
LE: loop exit
PB: predicated region body
PF: predicated region fallthrough
CT: control target
= control target key end

     0   :  { %8 = vsyncpa [#allocation3], 0  ;;  %s328_s0 = inlined_call_operand.hbm [shape: f32[16,256], index: 0, kind: input, shape index: {}]   ;;  %s329_s1 = inlined_call_operand.hbm [shape: f32[256,128], index: 1, kind: input, shape index: {}]   ;;  %s330_s2 = inlined_call_operand.vmem [shape: f32[1,128], index: 2, kind: input, shape index: {}]   ;;  %s331_s3 = inlined_call_operand.hbm [shape: f32[16,128], index: 3, kind: output, shape index: {}]  }
   0x1   :  { %9 = vsyncpa [#allocation6], 0 }
   0x2   :  { %10 = vsyncpa [#allocation4], 0  ;;  %s15_s14 = sshll.u32 %s328_s0, 4  ;;  %s283_s15 = smov [#allocation2]   ;;  %s16_s14 = int_to_ptr.hbm [resolvable:$true] %s15_s14 }
   0x3   :  { %s17_s16 = sshll.u32 %s283_s15, 4  ;;  %s28_s19 = sshll.u32 %s329_s1, 4  ;;  %s18_s16 = int_to_ptr.vmem [resolvable:$true] %s17_s16  ;;  %s29_s19 = int_to_ptr.hbm [resolvable:$true] %s28_s19 }
   0x4   :  { %s284_s20 = smov 256   ;;  %s285_s21 = smov 16  }
   0x5   :  { %23 = dma.hbm_to_vmem [thread:$0]  %s16_s14, 512, %s18_s16, [#allocation3], %s284_s20, %s284_s20, %s285_s21  }
   0x6   :  { %s286_s22 = smov [#allocation5]   ;;  %s287_s24 = smov 128  }
   0x7   :  { %s30_s23 = sshll.u32 %s286_s22, 4  ;;  %s288_s25 = smov 8   ;;  %s31_s23 = int_to_ptr.vmem [resolvable:$true] %s30_s23 }
   0x8   :  { %36 = dma.hbm_to_vmem [thread:$0]  %s29_s19, 4096, %s31_s23, [#allocation6], %s287_s24, %s287_s24, %s288_s25  }
   0x9   :  { %277 = dma.done.wait [#allocation3], 512  }
   0xa   :  { %278 = vsyncadd [#allocation3], 4294966784 }
   0xb   :  { %279 = dma.done.wait [#allocation6], 4096  }
   0xc   :  { %280 = vsyncadd [#allocation6], 4294963200  ;;  %v78_v0 = vld [vmem:[#allocation5 + $0x78] sm:$0xff]  ;;  %v77_v2 = vld [vmem:[#allocation5 + $0x70] sm:$0xff]  ;;  %s289_s26 = smov [#allocation7]   ;;  %s151_s30 = sshll.u32 %s331_s3, 4  ;;  %s152_s30 = int_to_ptr.hbm [resolvable:$true] %s151_s30 }
   0xd   :  { %v94_v1 = vld [vmem:[#allocation5 + $0xf8] sm:$0xff]  ;;  %165 = vmatpush.msra.mxu2 %v78_v0  ;;  %v93_v3 = vld [vmem:[#allocation5 + $0xf0] sm:$0xff]  ;;  %v76_v4 = vld [vmem:[#allocation5 + $0x68] sm:$0xff]  ;;  %95 = vmatpush.msra.mxu0 %v78_v0  ;;  %s149_s27 = sshll.u32 %s289_s26, 4  ;;  %s150_s27 = int_to_ptr.vmem [resolvable:$true] %s149_s27 }
   0xe   :  { %181 = vmatpush.msra.mxu3 %v94_v1  ;;  %v92_v5 = vld [vmem:[#allocation5 + $0xe8] sm:$0xff]  ;;  %118 = vmatpush.msra.mxu1 %v94_v1  ;;  %v75_v6 = vld [vmem:[#allocation5 + $0x60] sm:$0xff]  ;;  %v74_v8 = vld [vmem:[#allocation5 + $0x58] sm:$0xff] }
   0xf   :  { %166 = vmatpush.msra.mxu2 %v77_v2  ;;  %v91_v7 = vld [vmem:[#allocation5 + $0xe0] sm:$0xff]  ;;  %96 = vmatpush.msra.mxu0 %v77_v2  ;;  %v90_v9 = vld [vmem:[#allocation5 + $0xd8] sm:$0xff]  ;;  %v73_v10 = vld [vmem:[#allocation5 + $0x50] sm:$0xff] }
  0x10   :  { %182 = vmatpush.msra.mxu3 %v93_v3  ;;  %119 = vmatpush.msra.mxu1 %v93_v3  ;;  %v89_v11 = vld [vmem:[#allocation5 + $0xd0] sm:$0xff]  ;;  %v72_v12 = vld [vmem:[#allocation5 + $0x48] sm:$0xff]  ;;  %v71_v14 = vld [vmem:[#allocation5 + $0x40] sm:$0xff] }
  0x11   :  { %167 = vmatpush.msra.mxu2 %v76_v4  ;;  %97 = vmatpush.msra.mxu0 %v76_v4  ;;  %v88_v13 = vld [vmem:[#allocation5 + $0xc8] sm:$0xff]  ;;  %v87_v15 = vld [vmem:[#allocation5 + $0xc0] sm:$0xff]  ;;  %v70_v16 = vld [vmem:[#allocation5 + $0x38] sm:$0xff] }
  0x12   :  { %183 = vmatpush.msra.mxu3 %v92_v5  ;;  %120 = vmatpush.msra.mxu1 %v92_v5  ;;  %v86_v17 = vld [vmem:[#allocation5 + $0xb8] sm:$0xff]  ;;  %v69_v18 = vld [vmem:[#allocation5 + $0x30] sm:$0xff]  ;;  %v68_v20 = vld [vmem:[#allocation5 + $0x28] sm:$0xff] }
  0x13   :  { %168 = vmatpush.msra.mxu2 %v75_v6  ;;  %98 = vmatpush.msra.mxu0 %v75_v6  ;;  %v85_v19 = vld [vmem:[#allocation5 + $0xb0] sm:$0xff]  ;;  %v84_v21 = vld [vmem:[#allocation5 + $0xa8] sm:$0xff]  ;;  %v67_v22 = vld [vmem:[#allocation5 + $0x20] sm:$0xff] }
  0x14   :  { %184 = vmatpush.msra.mxu3 %v91_v7  ;;  %121 = vmatpush.msra.mxu1 %v91_v7  ;;  %v83_v23 = vld [vmem:[#allocation5 + $0xa0] sm:$0xff]  ;;  %v66_v24 = vld [vmem:[#allocation5 + $0x18] sm:$0xff]  ;;  %v65_v26 = vld [vmem:[#allocation5 + $0x10] sm:$0xff] }
  0x15   :  { %169 = vmatpush.msra.mxu2 %v74_v8  ;;  %99 = vmatpush.msra.mxu0 %v74_v8  ;;  %v82_v25 = vld [vmem:[#allocation5 + $0x98] sm:$0xff]  ;;  %v81_v27 = vld [vmem:[#allocation5 + $0x90] sm:$0xff]  ;;  %v64_v28 = vld [vmem:[#allocation5 + $0x8] sm:$0xff] }
  0x16   :  { %185 = vmatpush.msra.mxu3 %v90_v9  ;;  %122 = vmatpush.msra.mxu1 %v90_v9  ;;  %v80_v29 = vld [vmem:[#allocation5 + $0x88] sm:$0xff]  ;;  %v63_v30 = vld [vmem:[#allocation5] sm:$0xff]  ;;  %v61_v32 = vld [vmem:[#allocation2 + $0x10] sm:$0xff] }
  0x17   :  { %170 = vmatpush.msra.mxu2 %v73_v10  ;;  %100 = vmatpush.msra.mxu0 %v73_v10  ;;  %v79_v31 = vld [vmem:[#allocation5 + $0x80] sm:$0xff]  ;;  %v62_v33 = vld [vmem:[#allocation2 + $0x18] sm:$0xff]  ;;  %v60_v35 = vld [vmem:[#allocation2 + $0x8] sm:$0xff] }
  0x18   :  { %186 = vmatpush.msra.mxu3 %v89_v11  ;;  %123 = vmatpush.msra.mxu1 %v89_v11  ;;  %v59_v34 = vld [vmem:[#allocation2] sm:$0xff] }
  0x19   :  { %171 = vmatpush.msra.mxu2 %v72_v12  ;;  %101 = vmatpush.msra.mxu0 %v72_v12  ;;  %v204_v36 = vld [vmem:[%s330_s2] ss:$0 sm:$0xff] }
  0x1a   :  { %187 = vmatpush.msra.mxu3 %v88_v13  ;;  %124 = vmatpush.msra.mxu1 %v88_v13 }
  0x1b   :  { %172 = vmatpush.msra.mxu2 %v71_v14  ;;  %102 = vmatpush.msra.mxu0 %v71_v14 }
  0x1c   :  { %188 = vmatpush.msra.mxu3 %v87_v15  ;;  %125 = vmatpush.msra.mxu1 %v87_v15 }
  0x1d   :  { %173 = vmatpush.msra.mxu2 %v70_v16  ;;  %103 = vmatpush.msra.mxu0 %v70_v16 }
  0x1e   :  { %189 = vmatpush.msra.mxu3 %v86_v17  ;;  %126 = vmatpush.msra.mxu1 %v86_v17 }
  0x1f   :  { %174 = vmatpush.msra.mxu2 %v69_v18  ;;  %104 = vmatpush.msra.mxu0 %v69_v18 }
  0x20   :  { %190 = vmatpush.msra.mxu3 %v85_v19  ;;  %127 = vmatpush.msra.mxu1 %v85_v19 }
  0x21   :  { %175 = vmatpush.msra.mxu2 %v68_v20  ;;  %105 = vmatpush.msra.mxu0 %v68_v20 }
  0x22   :  { %191 = vmatpush.msra.mxu3 %v84_v21  ;;  %128 = vmatpush.msra.mxu1 %v84_v21 }
  0x23   :  { %176 = vmatpush.msra.mxu2 %v67_v22  ;;  %106 = vmatpush.msra.mxu0 %v67_v22 }
  0x24   :  { %192 = vmatpush.msra.mxu3 %v83_v23  ;;  %129 = vmatpush.msra.mxu1 %v83_v23 }
  0x25   :  { %177 = vmatpush.msra.mxu2 %v66_v24  ;;  %107 = vmatpush.msra.mxu0 %v66_v24 }
  0x26   :  { %193 = vmatpush.msra.mxu3 %v82_v25  ;;  %130 = vmatpush.msra.mxu1 %v82_v25 }
  0x27   :  { %178 = vmatpush.msra.mxu2 %v65_v26  ;;  %108 = vmatpush.msra.mxu0 %v65_v26 }
  0x28   :  { %194 = vmatpush.msra.mxu3 %v81_v27  ;;  %131 = vmatpush.msra.mxu1 %v81_v27 }
  0x29   :  { %179 = vmatpush.msra.mxu2 %v64_v28  ;;  %109 = vmatpush.msra.mxu0 %v64_v28 }
  0x2a   :  { %195 = vmatpush.msra.mxu3 %v80_v29  ;;  %132 = vmatpush.msra.mxu1 %v80_v29 }
  0x2b   :  { %180 = vmatpush.msra.mxu2 %v63_v30  ;;  %110 = vmatpush.msra.mxu0 %v63_v30 }
  0x2c   :  { %196 = vmatpush.msra.mxu3 %v79_v31  ;;  %114 = vmatmul.f32.vlgmr.msra.gmra.mxu2 %v61_v32 }
  0x2d   :  { %137 = vmatmul.f32.vlgmr.msra.gmra.mxu3 %v62_v33  ;;  %133 = vmatpush.msra.mxu1 %v79_v31 }
  0x2e   :  { %111 = vmatmul.f32.vlgmr.msra.gmra.mxu0 %v59_v34  ;;  %134 = vmatmul.f32.vlgmr.msra.gmra.mxu1 %v60_v35 }
  0xab   :  { %v112_v37 = vpop.f32.mrf.mxu0  ;;  %v135_v38 = vpop.f32.mrf.mxu1 }
  0xac   :  { %v136_v39 = vadd.f32 %v135_v38, %v112_v37 }
  0xae   :  { %v141_v40 = vadd.f32 %v204_v36, %v136_v39 }
  0xaf   :  { %v115_v41 = vpop.f32.mrf.mxu2 }
  0xb0   :  { %v138_v42 = vpop.f32.mrf.mxu3  ;;  %143 = vst [vmem:[#allocation7] sm:$0xff] %v141_v40 }
  0xb1   :  { %v139_v43 = vadd.f32 %v138_v42, %v115_v41 }
  0xb3   :  { %v142_v44 = vadd.f32 %v204_v36, %v139_v43 }
  0xb5   :  { %144 = vst [vmem:[#allocation7 + $0x8] sm:$0xff] %v142_v44 }
  0xb6   :  { %157 = dma.vmem_to_hbm [thread:$0]  %s150_s27, 256, %s152_s30, [#allocation4], %s287_s24, %s287_s24, %s288_s25  }
  0xb7   :  { %281 = dma.done.wait [#allocation4], 256  }
  0xb8   :  { %282 = vsyncadd [#allocation4], 4294967040 }
  0xb9   :  { %162 = vsyncpa [#allocation3], 1 }
  0xba   :  { %163 = vsyncpa [#allocation6], 1 }
  0xbb   :  { %164 = vsyncpa [#allocation4], 1 }

</bundles_post_ra>
